<compile_context>
chip_gen: v5e
topology: v5e:2x2
jax: 0.10.0
libtpu: 0.0.40
codegen_flags: <defaults>
</compile_context>

<pallas_src>
import functools

import jax
import jax.numpy as jnp
from jax.experimental import pallas as pl
from jax.experimental.pallas import tpu as pltpu

BN_EPS = 1e-5  # torch.nn.BatchNorm1d default


def _round_up(x, m):
    return ((x + m - 1) // m) * m


# ---------------------------------------------------------------------------
# Pallas kernel 1: fully fused shared MLP (1x1 Conv1d + training-mode BN + ReLU).
#   grid = (n_layers,); activation lives in VMEM scratch across all layers.
#   Layer 0 uses the rank-1 group_all shortcut; layers >0 are bf16 MXU matmuls.
#   BN stats are MXU dots against a masked ones column (centered two-pass var).
# TODO(synk): for production-sized B*L the lane axis needs tiling with a
# two-pass BN (stats pass + normalize pass) and a "parallel" BL axis for v7x's
# 2 TensorCores / 64 MiB VMEM; at these sizes the slab fits on every chip.
# ---------------------------------------------------------------------------
def fused_mlp(points_flat, ones_col, ws1, w_stack, g_stack, beta_stack, *,
              bl_real, c_pad, bl_pad, n_layers):
    inv_n = 1.0 / float(bl_real)

    def kernel(p_ref, ones_ref, ws1_ref, w_ref, g_ref, beta_ref, o_ref,
               act_ref, y_ref):
        l = pl.program_id(0)
        nl = pl.num_programs(0)

        @pl.when(l == 0)
        def _():
            # rank-1 first layer: group_all repeats the single feature row over
            # all input channels, so W1 @ X == rowsum(W1) * points_row.
            # (Conv1d bias omitted: training-mode BN mean subtraction cancels it.)
            y_ref[...] = ws1_ref[...] * p_ref[...]

        @pl.when(l > 0)
        def _():
            # bf16 x bf16 MXU matmul, f32 accumulate; ping-pong slabs so the
            # dot never reads and writes the same ref.
            y_ref[...] = jnp.dot(w_ref[0], act_ref[...].astype(jnp.bfloat16),
                                 preferred_element_type=jnp.float32)

        # Training-mode BatchNorm (biased var) + folded scale/shift + ReLU.
        # Stats via MXU dots against a masked ones column: padding lanes
        # contribute zero, so no full-slab lane mask is needed, and padded
        # lanes only ever feed padded lanes of the next layer.
        y = y_ref[...]
        ones = ones_ref[...]                                    # (bl_pad, 1)
        mean = jnp.dot(y, ones, preferred_element_type=jnp.float32) * inv_n
        d = y - mean                                            # centered (better numerics)
        var = jnp.dot(d * d, ones, preferred_element_type=jnp.float32) * inv_n
        scale = g_ref[0] * jax.lax.rsqrt(var + BN_EPS)
        a_new = jnp.maximum(scale * d + beta_ref[0], 0.0)

        @pl.when(l < nl - 1)
        def _():
            act_ref[...] = a_new

        @pl.when(l == nl - 1)
        def _():
            o_ref[...] = a_new.astype(o_ref.dtype)

    # Explicit VMEM budget: 2 f32 slabs + bf16 output block + double-buffered
    # bf16 weights + small vectors, with headroom.
    slab = c_pad * bl_pad * 4
    need = (2 * slab
            + 2 * c_pad * bl_pad * 2
            + 2 * 2 * c_pad * c_pad * 2
            + 4 * bl_pad * 4
            + 8 * c_pad * 4)
    vmem_limit = max(int(need * 1.5) + (4 << 20), 32 << 20)

    return pl.pallas_call(
        kernel,
        out_shape=jax.ShapeDtypeStruct((c_pad, bl_pad), jnp.bfloat16),
        grid=(n_layers,),
        in_specs=[
            pl.BlockSpec((1, bl_pad), lambda l: (0, 0)),           # points row (f32)
            pl.BlockSpec((bl_pad, 1), lambda l: (0, 0)),           # masked ones column
            pl.BlockSpec((c_pad, 1), lambda l: (0, 0)),            # rowsum(W1)
            pl.BlockSpec((1, c_pad, c_pad), lambda l: (l, 0, 0)),  # W_l (bf16)
            pl.BlockSpec((1, c_pad, 1), lambda l: (l, 0, 0)),      # gamma_l
            pl.BlockSpec((1, c_pad, 1), lambda l: (l, 0, 0)),      # beta_l
        ],
        out_specs=pl.BlockSpec((c_pad, bl_pad), lambda l: (0, 0)),
        scratch_shapes=[pltpu.VMEM((c_pad, bl_pad), jnp.float32),   # act (layer input)
                        pltpu.VMEM((c_pad, bl_pad), jnp.float32)],  # y   (layer output)
        compiler_params=pltpu.CompilerParams(
            dimension_semantics=("arbitrary",),
            vmem_limit_bytes=vmem_limit),
    )(points_flat, ones_col, ws1, w_stack, g_stack, beta_stack)


# ---------------------------------------------------------------------------
# Pallas kernel 2: exact pairwise squared euclidean distance.
#   d[m, k] = sum_c (a[m, c] - b[k, c])^2 via 3 VPU mul-adds (no MXU, no
#   |a|^2+|b|^2-2ab cancellation).  Grid over (M tiles, K tiles), both
#   "parallel"; K tile width is budget-checked so bigger chips get wider tiles.
# TODO(synk): for production K, fuse a running per-row top-npoint accumulator
# across K tiles instead of materializing the full (M, K) matrix + lax.top_k.
# ---------------------------------------------------------------------------
def _pairwise_sqdist_kernel(a_ref, bt_ref, o_ref):
    a = a_ref[...]            # (tm, 3)
    bt = bt_ref[...]          # (3, tk)
    d0 = a[:, 0:1] - bt[0:1, :]
    d1 = a[:, 1:2] - bt[1:2, :]
    d2 = a[:, 2:3] - bt[2:3, :]
    o_ref[...] = d0 * d0 + d1 * d1 + d2 * d2


def pairwise_sqdist(a, b):
    m, k = a.shape[0], b.shape[0]
    tm = min(512, _round_up(max(m, 8), 8))
    m_pad = _round_up(max(m, tm), tm)
    k_ru = _round_up(max(k, 128), 128)
    tk = 128
    for t in (2048, 1024, 512, 256, 128):
        if t <= k_ru and 2 * (tm + 3 + 1) * t * 4 <= (6 << 20):
            tk = t
            break
    k_pad = _round_up(max(k, tk), tk)

    a_p = jnp.zeros((m_pad, 3), jnp.float32).at[:m, :].set(a)
    bt_p = jnp.zeros((3, k_pad), jnp.float32).at[:, :k].set(b.T)
    out = pl.pallas_call(
        _pairwise_sqdist_kernel,
        out_shape=jax.ShapeDtypeStruct((m_pad, k_pad), jnp.float32),
        grid=(m_pad // tm, k_pad // tk),
        in_specs=[
            pl.BlockSpec((tm, 3), lambda i, j: (i, 0)),
            pl.BlockSpec((3, tk), lambda i, j: (0, j)),
        ],
        out_specs=pl.BlockSpec((tm, tk), lambda i, j: (i, j)),
        compiler_params=pltpu.CompilerParams(
            dimension_semantics=("parallel", "parallel")),
    )(a_p, bt_p)
    return out[:m, :k]


# ---------------------------------------------------------------------------
# Glue (plain JAX)
# ---------------------------------------------------------------------------
def farthest_point_sampling(xyz, npoint):
    # TODO(synk): torch.nn.functional.furthest_point_sampling does not exist in
    # PyTorch; standard deterministic FPS (seed point = index 0) substituted,
    # written with lax.fori_loop so the trace does not unroll at large npoint.
    def per_batch(pts):                                   # (N, 3) -> (npoint, 3)
        d0 = jnp.sum((pts - pts[0]) ** 2, axis=-1)
        sel0 = jnp.zeros((npoint,), jnp.int32)            # sel[0] = 0

        def body(i, carry):
            sel, d = carry
            nxt = jnp.argmax(d).astype(jnp.int32)
            sel = sel.at[i].set(nxt)
            d = jnp.minimum(d, jnp.sum((pts - pts[nxt]) ** 2, axis=-1))
            return (sel, d)

        sel, _ = jax.lax.fori_loop(1, npoint, body, (sel0, d0))
        return pts[sel]

    return jax.vmap(per_batch)(xyz)


def init_params(key, in_channel, mlp, npoint, length):
    params = {"convs": [], "bns": []}
    c_prev = in_channel
    for c_out in mlp:
        kw, kb, key = jax.random.split(key, 3)
        w = 0.1 * jax.random.normal(kw, (c_out, c_prev), jnp.float32)   # Conv1d weight (k=1)
        # Conv1d bias exists in the module but is exactly cancelled by
        # training-mode BatchNorm mean subtraction, so it never enters the kernel.
        b = 0.01 * jax.random.normal(kb, (c_out, 1), jnp.float32)
        gamma = 1.0 + 0.05 * jnp.arange(c_out, dtype=jnp.float32).reshape(c_out, 1)
        beta = 0.02 * jnp.arange(c_out, dtype=jnp.float32).reshape(c_out, 1)
        params["convs"].append((w, b))
        params["bns"].append((gamma, beta))
        c_prev = c_out
    kl, key = jax.random.split(key)
    # TODO(synk): reference calls F.linear(feature, 3*npoint) with an int as the
    # weight (not valid PyTorch); substituting a deterministic (3*npoint, L) weight.
    params["lin_w"] = 0.1 * jax.random.normal(kl, (3 * npoint, length), jnp.float32)
    return params


def pack_mlp_params(params):
    """Pad every layer to a common (C_pad, C_pad), stack, and store weights bf16."""
    ws = [w for (w, _) in params["convs"]]
    gs = [g for (g, _) in params["bns"]]
    bs = [bt for (_, bt) in params["bns"]]
    n_layers = len(ws)
    dims = [w.shape[0] for w in ws] + [w.shape[1] for w in ws[1:]]
    base = max(dims)
    # Lane-dense weight tiles once channels reach MXU scale (v6e/v7x).
    c_pad = _round_up(base, 128) if base > 64 else _round_up(base, 8)

    w_stack = jnp.zeros((n_layers, c_pad, c_pad), jnp.float32)
    g_stack = jnp.zeros((n_layers, c_pad, 1), jnp.float32)
    b_stack = jnp.zeros((n_layers, c_pad, 1), jnp.float32)
    for i, (w, g, bt) in enumerate(zip(ws, gs, bs)):
        co, ci = w.shape
        w_stack = w_stack.at[i, :co, :ci].set(w)
        g_stack = g_stack.at[i, :co, :].set(g)
        b_stack = b_stack.at[i, :co, :].set(bt)
    # rank-1 first layer: rowsum of W1 over its (identical) input channels.
    ws1 = jnp.zeros((c_pad, 1), jnp.float32).at[:ws[0].shape[0], :].set(
        jnp.sum(ws[0], axis=1, keepdims=True))
    return (ws1, w_stack.astype(jnp.bfloat16), g_stack, b_stack,
            c_pad, ws[-1].shape[0])


def pointnet_set_abstraction_forward(xyz, points, params, *, npoint, nsample,
                                     group_all=True):
    # TODO(synk): group_all=False branch needs nn.functional.batch_triangle_sample
    # (not a real PyTorch op); only the group_all=True branch is implemented.
    assert group_all
    del nsample  # group_all grouping repeats `points` nsample times -> rank-1, folded away
    B = xyz.shape[0]
    L = points.shape[1]
    bl = B * L

    new_xyz = farthest_point_sampling(xyz, npoint)                       # (B, npoint, 3)

    # Shared MLP (Conv1d k=1 + BN + ReLU per layer), fully fused in one Pallas call.
    ws1, w_stack, g_stack, b_stack, c_pad, c_last = pack_mlp_params(params)
    n_layers = w_stack.shape[0]
    bl_pad = max(_round_up(bl, 128), 512)                                # lane-dense
    p_flat = jnp.zeros((1, bl_pad), jnp.float32).at[0, :bl].set(points.reshape(-1))
    ones_col = (jnp.arange(bl_pad, dtype=jnp.int32) < bl).astype(
        jnp.float32).reshape(bl_pad, 1)

    x2d = fused_mlp(p_flat, ones_col, ws1, w_stack, g_stack, b_stack,
                    bl_real=bl, c_pad=c_pad, bl_pad=bl_pad, n_layers=n_layers)
    x2d = x2d[:c_last, :bl]                                              # (C_last, B*L) bf16
    feat = jnp.transpose(x2d.reshape(c_last, B, L), (1, 0, 2))           # (B, C_last, L) bf16

    # ---- group_all tail ----
    # F.linear contraction on the bf16 activation (MXU path), f32 accumulate.
    trans_vec = jnp.einsum("bcl,ol->bco", feat,
                           params["lin_w"].astype(jnp.bfloat16),
                           preferred_element_type=jnp.float32)           # (B, C_last, 3*npoint)
    trans_vec = jnp.transpose(trans_vec, (0, 2, 1)).reshape(-1, 3)       # (B*npoint*C_last, 3)
    new_xyz_flat = new_xyz.reshape(-1, 3)                                # (B*npoint, 3)

    pdist = pairwise_sqdist(new_xyz_flat, trans_vec)                     # (B*npoint, K)
    _, idx = jax.lax.top_k(-pdist, npoint)                               # npoint smallest dists
    new_xyz_out = new_xyz_flat[idx]                                      # (B*npoint, npoint, 3)

    # TODO(synk): reference indexes a dim of size batch_size with indices in
    # [0, B*npoint*C_last) (out of bounds in PyTorch); wrap with % batch_size to
    # keep the gather runnable.
    feat_view = feat.reshape(B, -1, npoint)
    pointcloud_feature = feat_view[idx % B].reshape(B, npoint, -1).astype(jnp.float32)
    return new_xyz_out, pointcloud_feature


if __name__ == "__main__":
    B, N, L = 2, 16, 16
    npoint, radius, nsample = 4, 0.4, 8
    in_channel = nsample          # group_all path: conv input channels == nsample
    mlp = [16, 32]

    key = jax.random.PRNGKey(0)
    kx, kp, kparam = jax.random.split(key, 3)
    xyz = jax.random.normal(kx, (B, N, 3), jnp.float32)
    points = jax.random.normal(kp, (B, L), jnp.float32)
    params = init_params(kparam, in_channel, mlp, npoint, L)

    fwd = jax.jit(functools.partial(
        pointnet_set_abstraction_forward,
        npoint=npoint, nsample=nsample, group_all=True))
    new_xyz, feat = fwd(xyz, points, params)
    jax.block_until_ready((new_xyz, feat))
    print("KERNEL_OK")
</pallas_src>

<mosaic_0001>
module attributes {stable_mosaic.version = 11 : i64} {
  func.func @kernel(%arg0: i32, %arg1: memref<1x512xf32, #tpu.memory_space<vmem>>, %arg2: memref<512x1xf32, #tpu.memory_space<vmem>>, %arg3: memref<32x1xf32, #tpu.memory_space<vmem>>, %arg4: memref<1x32x32xbf16, #tpu.memory_space<vmem>>, %arg5: memref<1x32x1xf32, #tpu.memory_space<vmem>>, %arg6: memref<1x32x1xf32, #tpu.memory_space<vmem>>, %arg7: memref<32x512xbf16, #tpu.memory_space<vmem>>, %arg8: memref<32x512xf32, #tpu.memory_space<vmem>>, %arg9: memref<32x512xf32, #tpu.memory_space<vmem>>) attributes {dimension_semantics = [#tpu.dimension_semantics<arbitrary>], iteration_bounds = array<i64: 2>, scalar_prefetch = 0 : i64, scratch_operands = 2 : i64, tpu.core_type = #tpu.core_type<tc>, window_params = [{pipeline_mode = #tpu.pipeline_mode<synchronous>, transform_indices = @transform_0, window_bounds = array<i64: 1, 512>}, {pipeline_mode = #tpu.pipeline_mode<synchronous>, transform_indices = @transform_1, window_bounds = array<i64: 512, 1>}, {pipeline_mode = #tpu.pipeline_mode<synchronous>, transform_indices = @transform_2, window_bounds = array<i64: 32, 1>}, {transform_indices = @transform_3, window_bounds = array<i64: 1, 32, 32>}, {transform_indices = @transform_4, window_bounds = array<i64: 1, 32, 1>}, {transform_indices = @transform_5, window_bounds = array<i64: 1, 32, 1>}, {pipeline_mode = #tpu.pipeline_mode<synchronous>, transform_indices = @transform_6, window_bounds = array<i64: 32, 512>}]} {
    %c0_i32 = arith.constant 0 : i32
    %0 = arith.cmpi eq, %arg0, %c0_i32 : i32
    %1 = arith.extui %0 : i1 to i32
    %c0_i32_0 = arith.constant 0 : i32
    %2 = arith.cmpi ne, %1, %c0_i32_0 : i32
    scf.if %2 {
      %c0_20 = arith.constant 0 : index
      %c0_21 = arith.constant 0 : index
      %37 = vector.load %arg3[%c0_20, %c0_21] : memref<32x1xf32, #tpu.memory_space<vmem>>, vector<32x1xf32>
      %c0_22 = arith.constant 0 : index
      %c0_23 = arith.constant 0 : index
      %38 = vector.load %arg1[%c0_22, %c0_23] : memref<1x512xf32, #tpu.memory_space<vmem>>, vector<1x512xf32>
      %39 = vector.broadcast %37 : vector<32x1xf32> to vector<32x512xf32>
      %40 = vector.broadcast %38 : vector<1x512xf32> to vector<32x512xf32>
      %41 = arith.mulf %39, %40 : vector<32x512xf32>
      %c0_24 = arith.constant 0 : index
      %c0_25 = arith.constant 0 : index
      %42 = vector.load %arg9[%c0_24, %c0_25] : memref<32x512xf32, #tpu.memory_space<vmem>>, vector<32x512xf32>
      tpu.vector_store %arg9[%c0_24, %c0_25], %41 {strides = array<i32>} : memref<32x512xf32, #tpu.memory_space<vmem>>, vector<32x512xf32>,
    } else {
    }
    %c0_i32_1 = arith.constant 0 : i32
    %3 = arith.cmpi sgt, %arg0, %c0_i32_1 : i32
    %4 = arith.extui %3 : i1 to i32
    %c0_i32_2 = arith.constant 0 : i32
    %5 = arith.cmpi ne, %4, %c0_i32_2 : i32
    scf.if %5 {
      %c0_20 = arith.constant 0 : index
      %c0_21 = arith.constant 0 : index
      %c0_22 = arith.constant 0 : index
      %37 = vector.load %arg4[%c0_20, %c0_21, %c0_22] : memref<1x32x32xbf16, #tpu.memory_space<vmem>>, vector<1x32x32xbf16>
      %38 = vector.shape_cast %37 : vector<1x32x32xbf16> to vector<32x32xbf16>
      %c0_23 = arith.constant 0 : index
      %c0_24 = arith.constant 0 : index
      %39 = vector.load %arg8[%c0_23, %c0_24] : memref<32x512xf32, #tpu.memory_space<vmem>>, vector<32x512xf32>
      %40 = arith.truncf %39 : vector<32x512xf32> to vector<32x512xbf16>
      %cst_25 = arith.constant dense<0.000000e+00> : vector<32x512xf32>
      %41 = tpu.matmul %38, %40, %cst_25 {dimension_numbers = #tpu.dot_dimension_numbers<[1], [0], [0], [1], [0, 0, 1, 1], [], []>} : vector<32x32xbf16>, vector<32x512xbf16>, vector<32x512xf32> -> vector<32x512xf32>
      %c0_26 = arith.constant 0 : index
      %c0_27 = arith.constant 0 : index
      %42 = vector.load %arg9[%c0_26, %c0_27] : memref<32x512xf32, #tpu.memory_space<vmem>>, vector<32x512xf32>
      tpu.vector_store %arg9[%c0_26, %c0_27], %41 {strides = array<i32>} : memref<32x512xf32, #tpu.memory_space<vmem>>, vector<32x512xf32>,
    } else {
    }
    %c0 = arith.constant 0 : index
    %c0_3 = arith.constant 0 : index
    %6 = vector.load %arg9[%c0, %c0_3] : memref<32x512xf32, #tpu.memory_space<vmem>>, vector<32x512xf32>
    %c0_4 = arith.constant 0 : index
    %c0_5 = arith.constant 0 : index
    %7 = vector.load %arg2[%c0_4, %c0_5] : memref<512x1xf32, #tpu.memory_space<vmem>>, vector<512x1xf32>
    %cst = arith.constant dense<0.000000e+00> : vector<32x1xf32>
    %8 = tpu.matmul %6, %7, %cst {dimension_numbers = #tpu.dot_dimension_numbers<[1], [0], [0], [1], [0, 0, 1, 1], [], []>} : vector<32x512xf32>, vector<512x1xf32>, vector<32x1xf32> -> vector<32x1xf32>
    %cst_6 = arith.constant 3.125000e-02 : f32
    %9 = vector.broadcast %cst_6 : f32 to vector<32x1xf32>
    %10 = arith.mulf %8, %9 : vector<32x1xf32>
    %11 = vector.broadcast %10 : vector<32x1xf32> to vector<32x512xf32>
    %12 = arith.subf %6, %11 : vector<32x512xf32>
    %13 = arith.mulf %12, %12 : vector<32x512xf32>
    %cst_7 = arith.constant dense<0.000000e+00> : vector<32x1xf32>
    %14 = tpu.matmul %13, %7, %cst_7 {dimension_numbers = #tpu.dot_dimension_numbers<[1], [0], [0], [1], [0, 0, 1, 1], [], []>} : vector<32x512xf32>, vector<512x1xf32>, vector<32x1xf32> -> vector<32x1xf32>
    %cst_8 = arith.constant 3.125000e-02 : f32
    %15 = vector.broadcast %cst_8 : f32 to vector<32x1xf32>
    %16 = arith.mulf %14, %15 : vector<32x1xf32>
    %c0_9 = arith.constant 0 : index
    %c0_10 = arith.constant 0 : index
    %c0_11 = arith.constant 0 : index
    %17 = vector.load %arg5[%c0_9, %c0_10, %c0_11] : memref<1x32x1xf32, #tpu.memory_space<vmem>>, vector<1x32x1xf32>
    %18 = vector.shape_cast %17 : vector<1x32x1xf32> to vector<32x1xf32>
    %cst_12 = arith.constant 9.99999974E-6 : f32
    %19 = vector.broadcast %cst_12 : f32 to vector<32x1xf32>
    %20 = arith.addf %16, %19 : vector<32x1xf32>
    %21 = math.rsqrt %20 : vector<32x1xf32>
    %22 = arith.mulf %18, %21 : vector<32x1xf32>
    %23 = vector.broadcast %22 : vector<32x1xf32> to vector<32x512xf32>
    %24 = arith.mulf %23, %12 : vector<32x512xf32>
    %c0_13 = arith.constant 0 : index
    %c0_14 = arith.constant 0 : index
    %c0_15 = arith.constant 0 : index
    %25 = vector.load %arg6[%c0_13, %c0_14, %c0_15] : memref<1x32x1xf32, #tpu.memory_space<vmem>>, vector<1x32x1xf32>
    %26 = vector.shape_cast %25 : vector<1x32x1xf32> to vector<32x1xf32>
    %27 = vector.broadcast %26 : vector<32x1xf32> to vector<32x512xf32>
    %28 = arith.addf %24, %27 : vector<32x512xf32>
    %cst_16 = arith.constant 0.000000e+00 : f32
    %29 = vector.broadcast %cst_16 : f32 to vector<32x512xf32>
    %30 = arith.maximumf %28, %29 : vector<32x512xf32>
    %c1_i32 = arith.constant 1 : i32
    %31 = arith.cmpi slt, %arg0, %c1_i32 : i32
    %32 = arith.extui %31 : i1 to i32
    %c0_i32_17 = arith.constant 0 : i32
    %33 = arith.cmpi ne, %32, %c0_i32_17 : i32
    scf.if %33 {
      %c0_20 = arith.constant 0 : index
      %c0_21 = arith.constant 0 : index
      %37 = vector.load %arg8[%c0_20, %c0_21] : memref<32x512xf32, #tpu.memory_space<vmem>>, vector<32x512xf32>
      tpu.vector_store %arg8[%c0_20, %c0_21], %30 {strides = array<i32>} : memref<32x512xf32, #tpu.memory_space<vmem>>, vector<32x512xf32>,
    } else {
    }
    %c1_i32_18 = arith.constant 1 : i32
    %34 = arith.cmpi eq, %arg0, %c1_i32_18 : i32
    %35 = arith.extui %34 : i1 to i32
    %c0_i32_19 = arith.constant 0 : i32
    %36 = arith.cmpi ne, %35, %c0_i32_19 : i32
    scf.if %36 {
      %37 = arith.truncf %30 : vector<32x512xf32> to vector<32x512xbf16>
      %c0_20 = arith.constant 0 : index
      %c0_21 = arith.constant 0 : index
      %38 = vector.load %arg7[%c0_20, %c0_21] : memref<32x512xbf16, #tpu.memory_space<vmem>>, vector<32x512xbf16>
      tpu.vector_store %arg7[%c0_20, %c0_21], %37 {strides = array<i32>} : memref<32x512xbf16, #tpu.memory_space<vmem>>, vector<32x512xbf16>,
    } else {
    }
    return
  }
  func.func @transform_0(%arg0: i32) -> (i32, i32) {
    %c0_i32 = arith.constant 0 : i32
    %c0_i32_0 = arith.constant 0 : i32
    %c0_i32_1 = arith.constant 0 : i32
    return %c0_i32, %c0_i32_0 : i32, i32
  }
  func.func @transform_1(%arg0: i32) -> (i32, i32) {
    %c0_i32 = arith.constant 0 : i32
    %c0_i32_0 = arith.constant 0 : i32
    %c0_i32_1 = arith.constant 0 : i32
    return %c0_i32, %c0_i32_0 : i32, i32
  }
  func.func @transform_2(%arg0: i32) -> (i32, i32) {
    %c0_i32 = arith.constant 0 : i32
    %c0_i32_0 = arith.constant 0 : i32
    %c0_i32_1 = arith.constant 0 : i32
    return %c0_i32, %c0_i32_0 : i32, i32
  }
  func.func @transform_3(%arg0: i32) -> (i32, i32, i32) {
    %c0_i32 = arith.constant 0 : i32
    %c0_i32_0 = arith.constant 0 : i32
    %c0_i32_1 = arith.constant 0 : i32
    return %arg0, %c0_i32, %c0_i32_0 : i32, i32, i32
  }
  func.func @transform_4(%arg0: i32) -> (i32, i32, i32) {
    %c0_i32 = arith.constant 0 : i32
    %c0_i32_0 = arith.constant 0 : i32
    %c0_i32_1 = arith.constant 0 : i32
    return %arg0, %c0_i32, %c0_i32_0 : i32, i32, i32
  }
  func.func @transform_5(%arg0: i32) -> (i32, i32, i32) {
    %c0_i32 = arith.constant 0 : i32
    %c0_i32_0 = arith.constant 0 : i32
    %c0_i32_1 = arith.constant 0 : i32
    return %arg0, %c0_i32, %c0_i32_0 : i32, i32, i32
  }
  func.func @transform_6(%arg0: i32) -> (i32, i32) {
    %c0_i32 = arith.constant 0 : i32
    %c0_i32_0 = arith.constant 0 : i32
    %c0_i32_1 = arith.constant 0 : i32
    return %c0_i32, %c0_i32_0 : i32, i32
  }
}

module attributes {stable_mosaic.version = 11 : i64} {
  func.func @_pairwise_sqdist_kernel(%arg0: i32, %arg1: i32, %arg2: memref<8x3xf32, #tpu.memory_space<vmem>>, %arg3: memref<3x256xf32, #tpu.memory_space<vmem>>, %arg4: memref<8x256xf32, #tpu.memory_space<vmem>>) attributes {dimension_semantics = [#tpu.dimension_semantics<parallel>, #tpu.dimension_semantics<parallel>], iteration_bounds = array<i64: 1, 1>, scalar_prefetch = 0 : i64, scratch_operands = 0 : i64, tpu.core_type = #tpu.core_type<tc>, window_params = [{transform_indices = @transform_0, window_bounds = array<i64: 8, 3>}, {transform_indices = @transform_1, window_bounds = array<i64: 3, 256>}, {transform_indices = @transform_2, window_bounds = array<i64: 8, 256>}]} {
    %c0 = arith.constant 0 : index
    %c0_0 = arith.constant 0 : index
    %0 = vector.load %arg2[%c0, %c0_0] : memref<8x3xf32, #tpu.memory_space<vmem>>, vector<8x3xf32>
    %c0_1 = arith.constant 0 : index
    %c0_2 = arith.constant 0 : index
    %1 = vector.load %arg3[%c0_1, %c0_2] : memref<3x256xf32, #tpu.memory_space<vmem>>, vector<3x256xf32>
    %2 = vector.extract_strided_slice %0 {offsets = [0, 0], sizes = [8, 1], strides = [1, 1]} : vector<8x3xf32> to vector<8x1xf32>
    %3 = vector.extract_strided_slice %1 {offsets = [0, 0], sizes = [1, 256], strides = [1, 1]} : vector<3x256xf32> to vector<1x256xf32>
    %4 = vector.broadcast %2 : vector<8x1xf32> to vector<8x256xf32>
    %5 = vector.broadcast %3 : vector<1x256xf32> to vector<8x256xf32>
    %6 = arith.subf %4, %5 : vector<8x256xf32>
    %7 = vector.extract_strided_slice %0 {offsets = [0, 1], sizes = [8, 1], strides = [1, 1]} : vector<8x3xf32> to vector<8x1xf32>
    %8 = vector.extract_strided_slice %1 {offsets = [1, 0], sizes = [1, 256], strides = [1, 1]} : vector<3x256xf32> to vector<1x256xf32>
    %9 = vector.broadcast %7 : vector<8x1xf32> to vector<8x256xf32>
    %10 = vector.broadcast %8 : vector<1x256xf32> to vector<8x256xf32>
    %11 = arith.subf %9, %10 : vector<8x256xf32>
    %12 = vector.extract_strided_slice %0 {offsets = [0, 2], sizes = [8, 1], strides = [1, 1]} : vector<8x3xf32> to vector<8x1xf32>
    %13 = vector.extract_strided_slice %1 {offsets = [2, 0], sizes = [1, 256], strides = [1, 1]} : vector<3x256xf32> to vector<1x256xf32>
    %14 = vector.broadcast %12 : vector<8x1xf32> to vector<8x256xf32>
    %15 = vector.broadcast %13 : vector<1x256xf32> to vector<8x256xf32>
    %16 = arith.subf %14, %15 : vector<8x256xf32>
    %17 = arith.mulf %6, %6 : vector<8x256xf32>
    %18 = arith.mulf %11, %11 : vector<8x256xf32>
    %19 = arith.addf %17, %18 : vector<8x256xf32>
    %20 = arith.mulf %16, %16 : vector<8x256xf32>
    %21 = arith.addf %19, %20 : vector<8x256xf32>
    %c0_3 = arith.constant 0 : index
    %c0_4 = arith.constant 0 : index
    %22 = vector.load %arg4[%c0_3, %c0_4] : memref<8x256xf32, #tpu.memory_space<vmem>>, vector<8x256xf32>
    tpu.vector_store %arg4[%c0_3, %c0_4], %21 {strides = array<i32>} : memref<8x256xf32, #tpu.memory_space<vmem>>, vector<8x256xf32>,
    return
  }
  func.func @transform_0(%arg0: i32, %arg1: i32) -> (i32, i32) {
    %c0_i32 = arith.constant 0 : i32
    %c0_i32_0 = arith.constant 0 : i32
    return %arg0, %c0_i32 : i32, i32
  }
  func.func @transform_1(%arg0: i32, %arg1: i32) -> (i32, i32) {
    %c0_i32 = arith.constant 0 : i32
    %c0_i32_0 = arith.constant 0 : i32
    return %c0_i32, %arg1 : i32, i32
  }
  func.func @transform_2(%arg0: i32, %arg1: i32) -> (i32, i32) {
    %c0_i32 = arith.constant 0 : i32
    return %arg0, %arg1 : i32, i32
  }
}

</mosaic_0001>

<bundles_post_ra>
// kernel: neg.1
= control target key start
LH: loop header
LB: loop body
LE: loop exit
PB: predicated region body
PF: predicated region fallthrough
CT: control target
= control target key end

     0   :  { %s40_s0 = inlined_call_operand.vmem [shape: f32[8,256], index: 0, kind: input, shape index: {}]   ;;  %s41_s1 = inlined_call_operand.vmem [shape: f32[8,256], index: 1, kind: output, shape index: {}]  }
   0x1   :  { %v2_v0 = vld [vmem:[%s40_s0] sm:$0xff]  ;;  %v16_v1 = vld [vmem:[%s40_s0 + $0x8] sm:$0xff] }
   0x2   :  { %v5_v2 = vxor.u32 2147483648, %v2_v0  ;;  %v12_v3 = vxor.u32 2147483648, %v16_v1 }
   0x4   :  { %7 = vst [vmem:[%s41_s1] sm:$0xff] %v5_v2 }
   0x5   :  { %17 = vst [vmem:[%s41_s1 + $0x8] sm:$0xff] %v12_v3 }

// kernel: pointnet_set_abstraction_forward.3
= control target key start
LH: loop header
LB: loop body
LE: loop exit
PB: predicated region body
PF: predicated region fallthrough
CT: control target
= control target key end

     0   :  { %v74_v0 = vmov 0   ;;  %v75_v2 = vmov 2   ;;  %v76_v3 = vmov 1   ;;  %s104_s0 = inlined_call_operand.vmem [shape: f32[8,3], index: 0, kind: input, shape index: {}]   ;;  %s105_s1 = inlined_call_operand.vmem [shape: f32[3,256], index: 1, kind: input, shape index: {}]   ;;  %s106_s2 = inlined_call_operand.vmem [shape: f32[8,256], index: 2, kind: output, shape index: {}]  }
   0x1   :  { %70 = vset.pattern.permute.xlu0 %v74_v0  ;;  %v11_v1 = vld [vmem:[%s104_s0] sm:$0xff]  ;;  %72 = vset.pattern.permute.xlu1 %v75_v2 }
   0x2   :  { %15 = vperm.xlu0 %70, %v11_v1   ;;  %40 = vperm.xlu1 %72, %v11_v1   ;;  %v12_v4 = vld [vmem:[%s105_s1] sm:$0x77] }
   0x3   :  { %v19_v5 = vperm.slane %v12_v4, 0  ;;  %v20_v6 = vperm.slane %v12_v4, 4  ;;  %v43_v8 = vperm.slane %v12_v4, 2  ;;  %v44_v9 = vperm.slane %v12_v4, 6 }
   0x4   :  { %v31_v10 = vperm.slane %v12_v4, 1  ;;  %v32_v11 = vperm.slane %v12_v4, 5 }
   0x5   :  { %v23_v12 = vperm.slane %v19_v5, 0  ;;  %v24_v13 = vperm.slane %v20_v6, 0  ;;  %v47_v14 = vperm.slane %v43_v8, 2  ;;  %v48_v15 = vperm.slane %v44_v9, 2 }
   0x6   :  { %v35_v17 = vperm.slane %v31_v10, 1  ;;  %v36_v18 = vperm.slane %v32_v11, 1 }
   0xa   :  { %71 = vset.pattern.permute.xlu0 %v76_v3 }
   0xb   :  { %28 = vperm.xlu0 %71, %v11_v1  }
  0x13   :  { %73 = vset.pattern.permute.xlu0 %v75_v2 }
  0x74   :  { %v16_v7 = vpop.permute.xlu0 %15  ;;  %v41_v16 = vpop.permute.xlu1 %40 }
  0x75   :  { %v25_v19 = vsub.f32 %v16_v7, %v23_v12  ;;  %v26_v20 = vsub.f32 %v16_v7, %v24_v13  ;;  %v49_v21 = vsub.f32 %v41_v16, %v47_v14  ;;  %v50_v22 = vsub.f32 %v41_v16, %v48_v15 }
  0x77   :  { %v51_v26 = vmul.f32 %v25_v19, %v25_v19  ;;  %v52_v27 = vmul.f32 %v26_v20, %v26_v20  ;;  %v57_v30 = vmul.f32 %v49_v21, %v49_v21  ;;  %v58_v31 = vmul.f32 %v50_v22, %v50_v22 }
  0x7d   :  { %v29_v23 = vpop.permute.xlu0 %28 }
  0x7e   :  { %v37_v24 = vsub.f32 %v29_v23, %v35_v17  ;;  %v38_v25 = vsub.f32 %v29_v23, %v36_v18 }
  0x80   :  { %v53_v28 = vmul.f32 %v37_v24, %v37_v24  ;;  %v54_v29 = vmul.f32 %v38_v25, %v38_v25 }
  0x82   :  { %v55_v32 = vadd.f32 %v53_v28, %v51_v26  ;;  %v56_v33 = vadd.f32 %v54_v29, %v52_v27 }
  0x84   :  { %v59_v34 = vadd.f32 %v57_v30, %v55_v32  ;;  %v60_v35 = vadd.f32 %v58_v31, %v56_v33 }
  0x86   :  { %61 = vst [vmem:[%s106_s2] sm:$0xff] %v59_v34 }
  0x87   :  { %62 = vst [vmem:[%s106_s2 + $0x8] sm:$0xff] %v60_v35 }

// kernel: pointnet_set_abstraction_forward.2
= control target key start
LH: loop header
LB: loop body
LE: loop exit
PB: predicated region body
PF: predicated region fallthrough
CT: control target
= control target key end

     0   :  { %s1202_s21 = smov 0   ;;  %s1905_s0 = inlined_call_operand.vmem [shape: f32[1,512], index: 0, kind: input, shape index: {}]   ;;  %s1906_s1 = inlined_call_operand.vmem [shape: f32[512,1], index: 1, kind: input, shape index: {}]   ;;  %s1907_s2 = inlined_call_operand.vmem [shape: f32[32,1], index: 2, kind: input, shape index: {}]   ;;  %s1908_s3 = inlined_call_operand.vmem [shape: bf16[2,32,32], index: 3, kind: input, shape index: {}]   ;;  %s1909_s4 = inlined_call_operand.vmem [shape: f32[2,32,1], index: 4, kind: input, shape index: {}]   ;;  %s1910_s5 = inlined_call_operand.vmem [shape: f32[2,32,1], index: 5, kind: input, shape index: {}]   ;;  %s1911_s6 = inlined_call_operand.vmem [shape: bf16[32,512], index: 6, kind: output, shape index: {}]  }
   0x1 LB: > { %s1208_s22 = sadd.s32 4294967295, %s1163_s21   ;;  %p1100_p0 = scmp.ge.s32.totalorder %s1163_s21, 1  ;;  %s1163_s21 = sphi %s1202_s21, %s16_s21  }
   0x2   : > { %p227_p1 = scmp.lt.s32.totalorder %s1163_s21, 3 }
   0x4   : > { %p228_p2 = pnand %p1100_p0, %p227_p1 }
   0x6   : > { %231 = sbr.rel (%p228_p2) target bundleno = 964 (0x3c4), region = 44 }
   0xb   : > { %p262_p3 = scmp.lt.s32.totalorder %s1208_s22, 1  ;;  %p1107_p4 = scmp.ne.s32.totalorder %s1208_s22, 0 }
   0xd   : > { %s263_s23 = scalar_select %p262_p3, %s1208_s22, 1 }
   0xe   : > { %281 = sbr.rel (%p1107_p4) target bundleno = 154 (0x9a), region = 48 }
   0xf   : > { %s1129_s24 = sshll.u32 %s263_s23, 4  ;;  %s1130_s25 = sshll.u32 %s263_s23, 5 }
  0x10   : > { %s1217_s28 = scalar_lea.vmem %s1908_s3, %s1129_s24  ;;  %s1222_s7 = scalar_lea.vmem %s1909_s4, %s1130_s25 }
  0x11   : > { %s1227_s10 = scalar_lea.vmem %s1910_s5, %s1130_s25 }
  0x13   : > { %v284_v0 = vld [vmem:[%s1907_s2 + $0x10] sm:$0xff]  ;;  %v282_v1 = vld [vmem:[%s1907_s2] sm:$0xff]  ;;  %v1165_v2 = vmov 0   ;;  %v285_v3 = vld [vmem:[%s1907_s2 + $0x18] sm:$0xff] }
  0x14   : > { %1145 = vset.pattern.permute.xlu1 %v1165_v2  ;;  %1144 = vset.pattern.permute.xlu0 %v1165_v2  ;;  %v283_v4 = vld [vmem:[%s1907_s2 + $0x8] sm:$0xff]  ;;  %v286_v5 = vld [vmem:[%s1905_s0] sm:$0xf] }
  0x15   : > { %299 = vperm.xlu1 %1145, %v284_v0   ;;  %289 = vperm.xlu0 %1144, %v282_v1   ;;  %v308_v6 = vperm.slane %v286_v5, 0  ;;  %v309_v7 = vperm.slane %v286_v5, 1  ;;  %v310_v8 = vperm.slane %v286_v5, 2  ;;  %v311_v9 = vperm.slane %v286_v5, 3 }
  0x1d   : > { %304 = vperm.xlu1 %1145, %v285_v3   ;;  %294 = vperm.xlu0 %1144, %v283_v4  }
  0x87   : > { %v300_v10 = vpop.permute.xlu1 %299  ;;  %v290_v11 = vpop.permute.xlu0 %289 }
  0x88   : > { %v324_v12 = vmul.f32 %v308_v6, %v300_v10  ;;  %v325_v13 = vmul.f32 %v309_v7, %v300_v10  ;;  %v326_v14 = vmul.f32 %v310_v8, %v300_v10  ;;  %v327_v15 = vmul.f32 %v311_v9, %v300_v10 }
  0x89   : > { %v316_v16 = vmul.f32 %v308_v6, %v290_v11  ;;  %v317_v17 = vmul.f32 %v309_v7, %v290_v11  ;;  %v318_v18 = vmul.f32 %v310_v8, %v290_v11  ;;  %v319_v19 = vmul.f32 %v311_v9, %v290_v11 }
  0x8a   : > { %340 = vst [vmem:[#allocation3 + $0x20] sm:$0xff] %v324_v12 }
  0x8b   : > { %341 = vst [vmem:[#allocation3 + $0x78] sm:$0xff] %v325_v13 }
  0x8c   : > { %342 = vst [vmem:[#allocation3 + $0x18] sm:$0xff] %v326_v14 }
  0x8d   : > { %343 = vst [vmem:[#allocation3 + $0x58] sm:$0xff] %v327_v15 }
  0x8e   : > { %332 = vst [vmem:[#allocation3 + $0x28] sm:$0xff] %v316_v16 }
  0x8f   : > { %333 = vst [vmem:[#allocation3 + $0x68] sm:$0xff] %v317_v17  ;;  %v305_v20 = vpop.permute.xlu1 %304  ;;  %v295_v21 = vpop.permute.xlu0 %294 }
  0x90   : > { %334 = vst [vmem:[#allocation3 + $0x10] sm:$0xff] %v318_v18  ;;  %v328_v22 = vmul.f32 %v308_v6, %v305_v20  ;;  %v329_v23 = vmul.f32 %v309_v7, %v305_v20  ;;  %v330_v24 = vmul.f32 %v310_v8, %v305_v20  ;;  %v331_v25 = vmul.f32 %v311_v9, %v305_v20 }
  0x91   : > { %335 = vst [vmem:[#allocation3 + $0x40] sm:$0xff] %v319_v19  ;;  %v320_v26 = vmul.f32 %v308_v6, %v295_v21  ;;  %v321_v27 = vmul.f32 %v309_v7, %v295_v21  ;;  %v322_v28 = vmul.f32 %v310_v8, %v295_v21  ;;  %v323_v29 = vmul.f32 %v311_v9, %v295_v21 }
  0x92   : > { %344 = vst [vmem:[#allocation3] sm:$0xff] %v328_v22 }
  0x93   : > { %345 = vst [vmem:[#allocation3 + $0x8] sm:$0xff] %v329_v23 }
  0x94   : > { %346 = vst [vmem:[#allocation3 + $0x60] sm:$0xff] %v330_v24 }
  0x95   : > { %347 = vst [vmem:[#allocation3 + $0x50] sm:$0xff] %v331_v25 }
  0x96   : > { %336 = vst [vmem:[#allocation3 + $0x48] sm:$0xff] %v320_v26 }
  0x97   : > { %337 = vst [vmem:[#allocation3 + $0x30] sm:$0xff] %v321_v27 }
  0x98   : > { %338 = vst [vmem:[#allocation3 + $0x70] sm:$0xff] %v322_v28 }
  0x99   : > { %339 = vst [vmem:[#allocation3 + $0x38] sm:$0xff] %v323_v29 }
  0x9a PF: > { %p1108_p5 = scmp.le.s32.totalorder %s1208_s22, 0 }
  0x9c   : > { %351 = sbr.rel (%p1108_p5) target bundleno = 330 (0x14a), region = 52 }
  0xa1   : > { %v364_v30 = vld [vmem:[#allocation2 + $0x40] sm:$0xff]  ;;  %v369_v34 = vld [vmem:[#allocation2 + $0x70] sm:$0xff]  ;;  %v370_v36 = vld [vmem:[#allocation2 + $0x78] sm:$0xff]  ;;  %vm390_vm0 = vcmask 261120  }
  0xa2   : > { %v368_v31 = vld [vmem:[#allocation2 + $0x60] sm:$0xff]  ;;  %v366_v35 = vld [vmem:[#allocation2 + $0x10] sm:$0xff]  ;;  %v367_v39 = vld [vmem:[#allocation2 + $0x38] sm:$0xff] }
  0xa3   : > { %v365_v32 = vld [vmem:[#allocation2 + $0x20] sm:$0xff]  ;;  %v376_v33 = vpack.c.bf16 %v368_v31, %v364_v30  ;;  %v378_v38 = vpack.c.bf16 %v370_v36, %v366_v35  ;;  %v371_v40 = vld [vmem:[#allocation2 + $0x28] sm:$0xff]  ;;  %v356_v41 = vld [vmem:[#allocation2 + $0x30] sm:$0xff] }
  0xa4   : > { %v377_v37 = vpack.c.bf16 %v369_v34, %v365_v32  ;;  %v379_v42 = vpack.c.bf16 %v371_v40, %v367_v39  ;;  %v360_v43 = vld [vmem:[#allocation2 + $0x50] sm:$0xff]  ;;  %v357_v44 = vld [vmem:[#allocation2] sm:$0xff]  ;;  %v361_v45 = vld [vmem:[#allocation2 + $0x68] sm:$0xff] }
  0xa5   : > { %403 = vmatpush.bf16.msra.mxu0 %v376_v33  ;;  %441 = vmatpush.bf16.msra.mxu2 %v378_v38  ;;  %v372_v46 = vpack.c.bf16 %v360_v43, %v356_v41  ;;  %v373_v47 = vpack.c.bf16 %v361_v45, %v357_v44  ;;  %v358_v48 = vld [vmem:[#allocation2 + $0x58] sm:$0xff]  ;;  %v362_v49 = vld [vmem:[#allocation2 + $0x8] sm:$0xff]  ;;  %v1132_v54 = vld [vmem:[%s1217_s28] sm:$0xff] }
  0xa6   : > { %422 = vmatpush.bf16.msra.mxu1 %v377_v37  ;;  %v359_v50 = vld [vmem:[#allocation2 + $0x18] sm:$0xff]  ;;  %460 = vmatpush.bf16.msra.mxu3 %v379_v42  ;;  %v374_v51 = vpack.c.bf16 %v362_v49, %v358_v48  ;;  %v363_v52 = vld [vmem:[#allocation2 + $0x48] sm:$0xff] }
  0xa7   : > { %v375_v53 = vpack.c.bf16 %v363_v52, %v359_v50  ;;  %v1133_v55 = vld [vmem:[%s1217_s28 + $0x8] sm:$0xff] }
  0xa9   : > { %404 = vmatpush.bf16.msra.mxu0 %v372_v46  ;;  %442 = vmatpush.bf16.msra.mxu2 %v374_v51 }
  0xaa   : > { %423 = vmatpush.bf16.msra.mxu1 %v373_v47  ;;  %461 = vmatpush.bf16.msra.mxu3 %v375_v53 }
  0xac   : > { %1117 = vmatmul.msk.bf16.vlgmr.msra.gmra.mxu0 %vm390_vm0, %v1132_v54  ;;  %1121 = vmatmul.msk.bf16.vlgmr.msra.gmra.mxu2 %vm390_vm0, %v1132_v54 }
  0xad   : > { %1119 = vmatmul.msk.bf16.vlgmr.msra.gmra.mxu1 %vm390_vm0, %v1132_v54  ;;  %1123 = vmatmul.msk.bf16.vlgmr.msra.gmra.mxu3 %vm390_vm0, %v1132_v54 }
  0xbc   : > { %1118 = vmatmul.msk.bf16.gmra.mxu0 %vm390_vm0, %v1133_v55  ;;  %1122 = vmatmul.msk.bf16.gmra.mxu2 %vm390_vm0, %v1133_v55 }
  0xbd   : > { %1120 = vmatmul.msk.bf16.gmra.mxu1 %vm390_vm0, %v1133_v55  ;;  %1124 = vmatmul.msk.bf16.gmra.mxu3 %vm390_vm0, %v1133_v55 }
 0x129   : > { %v406_v56 = vpop.f32.mrf.mxu0 }
 0x12a   : > { %473 = vst [vmem:[#allocation3 + $0x28] sm:$0xff] %v406_v56  ;;  %v425_v57 = vpop.f32.mrf.mxu1 }
 0x12b   : > { %474 = vst [vmem:[#allocation3 + $0x68] sm:$0xff] %v425_v57 }
 0x12f   : > { %v444_v58 = vpop.f32.mrf.mxu2 }
 0x130   : > { %475 = vst [vmem:[#allocation3 + $0x10] sm:$0xff] %v444_v58  ;;  %v463_v59 = vpop.f32.mrf.mxu3 }
 0x131   : > { %v408_v60 = vpop.f32.mrf.mxu0  ;;  %476 = vst [vmem:[#allocation3 + $0x40] sm:$0xff] %v463_v59 }
 0x132   : > { %v427_v61 = vpop.f32.mrf.mxu1  ;;  %477 = vst [vmem:[#allocation3 + $0x48] sm:$0xff] %v408_v60 }
 0x133   : > { %478 = vst [vmem:[#allocation3 + $0x30] sm:$0xff] %v427_v61 }
 0x137   : > { %v446_v62 = vpop.f32.mrf.mxu2 }
 0x138   : > { %479 = vst [vmem:[#allocation3 + $0x70] sm:$0xff] %v446_v62  ;;  %v465_v63 = vpop.f32.mrf.mxu3 }
 0x139   : > { %v411_v0 = vpop.f32.mrf.mxu0  ;;  %480 = vst [vmem:[#allocation3 + $0x38] sm:$0xff] %v465_v63 }
 0x13a   : > { %v430_v1 = vpop.f32.mrf.mxu1  ;;  %481 = vst [vmem:[#allocation3 + $0x20] sm:$0xff] %v411_v0 }
 0x13b   : > { %482 = vst [vmem:[#allocation3 + $0x78] sm:$0xff] %v430_v1 }
 0x13f   : > { %v449_v2 = vpop.f32.mrf.mxu2 }
 0x140   : > { %483 = vst [vmem:[#allocation3 + $0x18] sm:$0xff] %v449_v2  ;;  %v468_v3 = vpop.f32.mrf.mxu3 }
 0x141   : > { %v413_v4 = vpop.f32.mrf.mxu0  ;;  %484 = vst [vmem:[#allocation3 + $0x58] sm:$0xff] %v468_v3 }
 0x142   : > { %v432_v5 = vpop.f32.mrf.mxu1  ;;  %485 = vst [vmem:[#allocation3] sm:$0xff] %v413_v4 }
 0x143   : > { %486 = vst [vmem:[#allocation3 + $0x8] sm:$0xff] %v432_v5 }
 0x147   : > { %v451_v6 = vpop.f32.mrf.mxu2 }
 0x148   : > { %487 = vst [vmem:[#allocation3 + $0x60] sm:$0xff] %v451_v6  ;;  %v470_v7 = vpop.f32.mrf.mxu3 }
 0x149   : > { %488 = vst [vmem:[#allocation3 + $0x50] sm:$0xff] %v470_v7 }
 0x14a PF: > { %v1251_v8 = vld [vmem:[%s1906_s1 + $0x178] sm:$0xff]  ;;  %v1256_v9 = vld [vmem:[%s1906_s1 + $0x170] sm:$0xff]  ;;  %v1278_v13 = vld [vmem:[%s1906_s1 + $0x168] sm:$0xff]  ;;  %p1125_p6 = scmp.ge.s32.totalorder %s1208_s22, 1 }
 0x14b   : > { %v1261_v10 = vld [vmem:[%s1906_s1 + $0x1f8] sm:$0xff]  ;;  %627 = vmatpush.msra.mxu2 %v1251_v8  ;;  %v1285_v14 = vld [vmem:[%s1906_s1 + $0x1f0] sm:$0xff]  ;;  %v1302_v17 = vld [vmem:[%s1906_s1 + $0x1e8] sm:$0xff] }
 0x14c   : > { %656 = vmatpush.msra.mxu3 %v1261_v10  ;;  %v1268_v11 = vld [vmem:[%s1906_s1 + $0x78] sm:$0xff]  ;;  %v1290_v15 = vld [vmem:[%s1906_s1 + $0x70] sm:$0xff]  ;;  %v1307_v18 = vld [vmem:[%s1906_s1 + $0x68] sm:$0xff] }
 0x14d   : > { %v1273_v12 = vld [vmem:[%s1906_s1 + $0xf8] sm:$0xff]  ;;  %569 = vmatpush.msra.mxu0 %v1268_v11  ;;  %v1295_v16 = vld [vmem:[%s1906_s1 + $0xf0] sm:$0xff]  ;;  %628 = vmatpush.msra.mxu2 %v1256_v9  ;;  %v1314_v19 = vld [vmem:[%s1906_s1 + $0x160] sm:$0xff] }
 0x14e   : > { %598 = vmatpush.msra.mxu1 %v1273_v12  ;;  %657 = vmatpush.msra.mxu3 %v1285_v14  ;;  %v1319_v20 = vld [vmem:[%s1906_s1 + $0xe8] sm:$0xff]  ;;  %v1324_v21 = vld [vmem:[%s1906_s1 + $0x1e0] sm:$0xff]  ;;  %v1343_v24 = vld [vmem:[%s1906_s1 + $0x158] sm:$0xff] }
 0x14f   : > { %570 = vmatpush.msra.mxu0 %v1290_v15  ;;  %629 = vmatpush.msra.mxu2 %v1278_v13  ;;  %v1331_v22 = vld [vmem:[%s1906_s1 + $0x60] sm:$0xff]  ;;  %v1348_v25 = vld [vmem:[%s1906_s1 + $0x1d8] sm:$0xff]  ;;  %v1367_v28 = vld [vmem:[%s1906_s1 + $0x150] sm:$0xff] }
 0x150   : > { %599 = vmatpush.msra.mxu1 %v1295_v16  ;;  %658 = vmatpush.msra.mxu3 %v1302_v17  ;;  %v1336_v23 = vld [vmem:[%s1906_s1 + $0xe0] sm:$0xff]  ;;  %v1355_v26 = vld [vmem:[%s1906_s1 + $0x58] sm:$0xff]  ;;  %v1372_v29 = vld [vmem:[%s1906_s1 + $0x1d0] sm:$0xff] }
 0x151   : > { %571 = vmatpush.msra.mxu0 %v1307_v18  ;;  %630 = vmatpush.msra.mxu2 %v1314_v19  ;;  %v1360_v27 = vld [vmem:[%s1906_s1 + $0xd8] sm:$0xff]  ;;  %v1379_v30 = vld [vmem:[%s1906_s1 + $0x50] sm:$0xff]  ;;  %v1391_v32 = vld [vmem:[%s1906_s1 + $0x148] sm:$0xff] }
 0x152   : > { %600 = vmatpush.msra.mxu1 %v1319_v20  ;;  %659 = vmatpush.msra.mxu3 %v1324_v21  ;;  %v1384_v31 = vld [vmem:[%s1906_s1 + $0xd0] sm:$0xff]  ;;  %v1396_v33 = vld [vmem:[%s1906_s1 + $0x1c8] sm:$0xff]  ;;  %v1415_v36 = vld [vmem:[%s1906_s1 + $0x140] sm:$0xff] }
 0x153   : > { %572 = vmatpush.msra.mxu0 %v1331_v22  ;;  %631 = vmatpush.msra.mxu2 %v1343_v24  ;;  %v1403_v34 = vld [vmem:[%s1906_s1 + $0x48] sm:$0xff]  ;;  %v1420_v37 = vld [vmem:[%s1906_s1 + $0x1c0] sm:$0xff]  ;;  %v1439_v40 = vld [vmem:[%s1906_s1 + $0x138] sm:$0xff] }
 0x154   : > { %601 = vmatpush.msra.mxu1 %v1336_v23  ;;  %660 = vmatpush.msra.mxu3 %v1348_v25  ;;  %v1408_v35 = vld [vmem:[%s1906_s1 + $0xc8] sm:$0xff]  ;;  %v1427_v38 = vld [vmem:[%s1906_s1 + $0x40] sm:$0xff]  ;;  %v1444_v41 = vld [vmem:[%s1906_s1 + $0x1b8] sm:$0xff] }
 0x155   : > { %573 = vmatpush.msra.mxu0 %v1355_v26  ;;  %632 = vmatpush.msra.mxu2 %v1367_v28  ;;  %v1432_v39 = vld [vmem:[%s1906_s1 + $0xc0] sm:$0xff]  ;;  %v1451_v42 = vld [vmem:[%s1906_s1 + $0x38] sm:$0xff]  ;;  %v1463_v44 = vld [vmem:[%s1906_s1 + $0x130] sm:$0xff] }
 0x156   : > { %602 = vmatpush.msra.mxu1 %v1360_v27  ;;  %661 = vmatpush.msra.mxu3 %v1372_v29  ;;  %v1456_v43 = vld [vmem:[%s1906_s1 + $0xb8] sm:$0xff]  ;;  %v1468_v45 = vld [vmem:[%s1906_s1 + $0x1b0] sm:$0xff]  ;;  %v1487_v48 = vld [vmem:[%s1906_s1 + $0x128] sm:$0xff] }
 0x157   : > { %574 = vmatpush.msra.mxu0 %v1379_v30  ;;  %633 = vmatpush.msra.mxu2 %v1391_v32  ;;  %v1475_v46 = vld [vmem:[%s1906_s1 + $0x30] sm:$0xff]  ;;  %v1492_v49 = vld [vmem:[%s1906_s1 + $0x1a8] sm:$0xff]  ;;  %v1511_v52 = vld [vmem:[%s1906_s1 + $0x120] sm:$0xff] }
 0x158   : > { %603 = vmatpush.msra.mxu1 %v1384_v31  ;;  %662 = vmatpush.msra.mxu3 %v1396_v33  ;;  %v1480_v47 = vld [vmem:[%s1906_s1 + $0xb0] sm:$0xff]  ;;  %v1499_v50 = vld [vmem:[%s1906_s1 + $0x28] sm:$0xff]  ;;  %v1516_v53 = vld [vmem:[%s1906_s1 + $0x1a0] sm:$0xff] }
 0x159   : > { %575 = vmatpush.msra.mxu0 %v1403_v34  ;;  %634 = vmatpush.msra.mxu2 %v1415_v36  ;;  %v1504_v51 = vld [vmem:[%s1906_s1 + $0xa8] sm:$0xff]  ;;  %v1523_v54 = vld [vmem:[%s1906_s1 + $0x20] sm:$0xff]  ;;  %v1535_v56 = vld [vmem:[%s1906_s1 + $0x118] sm:$0xff] }
 0x15a   : > { %604 = vmatpush.msra.mxu1 %v1408_v35  ;;  %663 = vmatpush.msra.mxu3 %v1420_v37  ;;  %v1528_v55 = vld [vmem:[%s1906_s1 + $0xa0] sm:$0xff]  ;;  %v1540_v57 = vld [vmem:[%s1906_s1 + $0x198] sm:$0xff]  ;;  %v1559_v60 = vld [vmem:[%s1906_s1 + $0x110] sm:$0xff] }
 0x15b   : > { %576 = vmatpush.msra.mxu0 %v1427_v38  ;;  %635 = vmatpush.msra.mxu2 %v1439_v40  ;;  %v1547_v58 = vld [vmem:[%s1906_s1 + $0x18] sm:$0xff]  ;;  %v1564_v61 = vld [vmem:[%s1906_s1 + $0x190] sm:$0xff]  ;;  %v1583_v0 = vld [vmem:[%s1906_s1 + $0x108] sm:$0xff] }
 0x15c   : > { %605 = vmatpush.msra.mxu1 %v1432_v39  ;;  %664 = vmatpush.msra.mxu3 %v1444_v41  ;;  %v1552_v59 = vld [vmem:[%s1906_s1 + $0x98] sm:$0xff]  ;;  %1919 = vst [vmem:[#allocation4_spill] sm:$0xff] %v1564_v61  ;;  %v1571_v62 = vld [vmem:[%s1906_s1 + $0x10] sm:$0xff]  ;;  %v1588_v1 = vld [vmem:[%s1906_s1 + $0x188] sm:$0xff] }
 0x15d   : > { %577 = vmatpush.msra.mxu0 %v1451_v42  ;;  %636 = vmatpush.msra.mxu2 %v1463_v44  ;;  %v1576_v63 = vld [vmem:[%s1906_s1 + $0x90] sm:$0xff]  ;;  %1921 = vst [vmem:[#allocation6_spill] sm:$0xff] %v1583_v0  ;;  %v1595_v2 = vld [vmem:[%s1906_s1 + $0x8] sm:$0xff]  ;;  %v1607_v4 = vld [vmem:[%s1906_s1 + $0x100] sm:$0xff] }
 0x15e   : > { %606 = vmatpush.msra.mxu1 %v1456_v43  ;;  %665 = vmatpush.msra.mxu3 %v1468_v45  ;;  %1920 = vst [vmem:[#allocation5_spill] sm:$0xff] %v1576_v63  ;;  %v1600_v3 = vld [vmem:[%s1906_s1 + $0x88] sm:$0xff]  ;;  %v1612_v5 = vld [vmem:[%s1906_s1 + $0x180] sm:$0xff]  ;;  %v1616_v6 = vld [vmem:[#allocation3 + $0x10] sm:$0xff] }
 0x15f   : > { %578 = vmatpush.msra.mxu0 %v1475_v46  ;;  %637 = vmatpush.msra.mxu2 %v1487_v48  ;;  %1922 = vst [vmem:[#allocation7_spill] sm:$0xff] %v1588_v1  ;;  %v1618_v7 = vld [vmem:[#allocation3 + $0x40] sm:$0xff] }
 0x160   : > { %607 = vmatpush.msra.mxu1 %v1480_v47  ;;  %666 = vmatpush.msra.mxu3 %v1492_v49  ;;  %1923 = vst [vmem:[#allocation8_spill] sm:$0xff] %v1612_v5 }
 0x161   : > { %579 = vmatpush.msra.mxu0 %v1499_v50  ;;  %638 = vmatpush.msra.mxu2 %v1511_v52  ;;  %1924 = vst [vmem:[#allocation9_spill] sm:$0xff] %v1616_v6 }
 0x162   : > { %608 = vmatpush.msra.mxu1 %v1504_v51  ;;  %667 = vmatpush.msra.mxu3 %v1516_v53  ;;  %1925 = vst [vmem:[#allocation10_spill] sm:$0xff] %v1618_v7 }
 0x163   : > { %580 = vmatpush.msra.mxu0 %v1523_v54  ;;  %639 = vmatpush.msra.mxu2 %v1535_v56 }
 0x164   : > { %609 = vmatpush.msra.mxu1 %v1528_v55  ;;  %668 = vmatpush.msra.mxu3 %v1540_v57 }
 0x165   : > { %581 = vmatpush.msra.mxu0 %v1547_v58  ;;  %640 = vmatpush.msra.mxu2 %v1559_v60 }
 0x166   : > { %610 = vmatpush.msra.mxu1 %v1552_v59  ;;  %669 = vmatpush.msra.mxu3 %v1564_v61  ;;  %v1625_v61 = vld [vmem:[%s1906_s1] sm:$0xff] }
 0x167   : > { %582 = vmatpush.msra.mxu0 %v1571_v62  ;;  %641 = vmatpush.msra.mxu2 %v1583_v0  ;;  %v1636_v0 = vld [vmem:[#allocation3 + $0x68] sm:$0xff] }
 0x168   : > { %611 = vmatpush.msra.mxu1 %v1576_v63  ;;  %670 = vmatpush.msra.mxu3 %v1588_v1  ;;  %v1630_v63 = vld [vmem:[%s1906_s1 + $0x80] sm:$0xff]  ;;  %v1634_v1 = vld [vmem:[#allocation3 + $0x28] sm:$0xff] }
 0x169   : > { %583 = vmatpush.msra.mxu0 %v1595_v2  ;;  %642 = vmatpush.msra.mxu2 %v1607_v4 }
 0x16a   : > { %612 = vmatpush.msra.mxu1 %v1600_v3  ;;  %671 = vmatpush.msra.mxu3 %v1612_v5  ;;  %v1648_v5 = vld [vmem:[#allocation3 + $0x70] sm:$0xff] }
 0x16b   : > { %643 = vmatmul.f32.vlgmr.msra.gmra.mxu2 %v1616_v6  ;;  %672 = vmatmul.f32.vlgmr.msra.gmra.mxu3 %v1618_v7  ;;  %v1650_v6 = vld [vmem:[#allocation3 + $0x38] sm:$0xff]  ;;  %v1656_v7 = vld [vmem:[#allocation3 + $0x48] sm:$0xff] }
 0x16c   : > { %584 = vmatpush.msra.mxu0 %v1625_v61  ;;  %613 = vmatpush.msra.mxu1 %v1630_v63 }
 0x16d   : > { %585 = vmatmul.f32.vlgmr.msra.gmra.mxu0 %v1634_v1  ;;  %614 = vmatmul.f32.vlgmr.msra.gmra.mxu1 %v1636_v0 }
 0x16e   : > { %799 = vmatpush.msrb.mxu2 %v1251_v8  ;;  %741 = vmatpush.msrb.mxu0 %v1268_v11  ;;  %v1658_v8 = vld [vmem:[#allocation3 + $0x30] sm:$0xff]  ;;  %v1680_v11 = vld [vmem:[#allocation3 + $0x20] sm:$0xff] }
 0x16f   : > { %770 = vmatpush.msrb.mxu1 %v1273_v12  ;;  %828 = vmatpush.msrb.mxu3 %v1261_v10  ;;  %v1674_v10 = vld [vmem:[#allocation3 + $0x58] sm:$0xff] }
 0x170   : > { %800 = vmatpush.msrb.mxu2 %v1256_v9  ;;  %742 = vmatpush.msrb.mxu0 %v1290_v15  ;;  %v1672_v9 = vld [vmem:[#allocation3 + $0x18] sm:$0xff]  ;;  %v1704_v15 = vld [vmem:[#allocation3] sm:$0xff] }
 0x171   : > { %771 = vmatpush.msrb.mxu1 %v1295_v16  ;;  %829 = vmatpush.msrb.mxu3 %v1285_v14  ;;  %v1682_v12 = vld [vmem:[#allocation3 + $0x78] sm:$0xff]  ;;  %v1698_v14 = vld [vmem:[#allocation3 + $0x50] sm:$0xff]  ;;  %v1706_v16 = vld [vmem:[#allocation3 + $0x8] sm:$0xff] }
 0x172   : > { %801 = vmatpush.msrb.mxu2 %v1278_v13  ;;  %743 = vmatpush.msrb.mxu0 %v1307_v18  ;;  %v1696_v13 = vld [vmem:[#allocation3 + $0x60] sm:$0xff] }
 0x173   : > { %646 = vmatmul.f32.gmra.mxu2 %v1648_v5  ;;  %675 = vmatmul.f32.gmra.mxu3 %v1650_v6  ;;  %v1927_v18 = vld [vmem:[#allocation4_spill] sm:$0xff] }
 0x174   : > { %772 = vmatpush.msrb.mxu1 %v1319_v20  ;;  %830 = vmatpush.msrb.mxu3 %v1302_v17  ;;  %v1926_v17 = vld [vmem:[#allocation5_spill] sm:$0xff]  ;;  %v1929_v20 = vld [vmem:[#allocation7_spill] sm:$0xff] }
 0x175   : > { %588 = vmatmul.f32.gmra.mxu0 %v1656_v7  ;;  %617 = vmatmul.f32.gmra.mxu1 %v1658_v8 }
 0x176   : > { %802 = vmatpush.msrb.mxu2 %v1314_v19  ;;  %744 = vmatpush.msrb.mxu0 %v1331_v22  ;;  %v1928_v19 = vld [vmem:[#allocation6_spill] sm:$0xff]  ;;  %v1166_v22 = vmov 0  }
 0x177   : > { %773 = vmatpush.msrb.mxu1 %v1336_v23  ;;  %831 = vmatpush.msrb.mxu3 %v1324_v21  ;;  %v1930_v21 = vld [vmem:[#allocation8_spill] sm:$0xff] }
 0x178   : > { %803 = vmatpush.msrb.mxu2 %v1343_v24  ;;  %745 = vmatpush.msrb.mxu0 %v1355_v26 }
 0x179   : > { %774 = vmatpush.msrb.mxu1 %v1360_v27  ;;  %832 = vmatpush.msrb.mxu3 %v1348_v25 }
 0x17a   : > { %804 = vmatpush.msrb.mxu2 %v1367_v28  ;;  %746 = vmatpush.msrb.mxu0 %v1379_v30 }
 0x17b   : > { %649 = vmatmul.f32.gmra.mxu2 %v1672_v9  ;;  %678 = vmatmul.f32.gmra.mxu3 %v1674_v10 }
 0x17c   : > { %775 = vmatpush.msrb.mxu1 %v1384_v31  ;;  %833 = vmatpush.msrb.mxu3 %v1372_v29 }
 0x17d   : > { %591 = vmatmul.f32.gmra.mxu0 %v1680_v11  ;;  %620 = vmatmul.f32.gmra.mxu1 %v1682_v12 }
 0x17e   : > { %805 = vmatpush.msrb.mxu2 %v1391_v32  ;;  %747 = vmatpush.msrb.mxu0 %v1403_v34 }
 0x17f   : > { %776 = vmatpush.msrb.mxu1 %v1408_v35  ;;  %834 = vmatpush.msrb.mxu3 %v1396_v33 }
 0x180   : > { %806 = vmatpush.msrb.mxu2 %v1415_v36  ;;  %748 = vmatpush.msrb.mxu0 %v1427_v38 }
 0x181   : > { %777 = vmatpush.msrb.mxu1 %v1432_v39  ;;  %835 = vmatpush.msrb.mxu3 %v1420_v37 }
 0x182   : > { %807 = vmatpush.msrb.mxu2 %v1439_v40  ;;  %749 = vmatpush.msrb.mxu0 %v1451_v42 }
 0x183   : > { %652 = vmatmul.f32.gmra.mxu2 %v1696_v13  ;;  %681 = vmatmul.f32.gmra.mxu3 %v1698_v14 }
 0x184   : > { %778 = vmatpush.msrb.mxu1 %v1456_v43  ;;  %836 = vmatpush.msrb.mxu3 %v1444_v41 }
 0x185   : > { %594 = vmatmul.f32.gmra.mxu0 %v1704_v15  ;;  %623 = vmatmul.f32.gmra.mxu1 %v1706_v16 }
 0x186   : > { %808 = vmatpush.msrb.mxu2 %v1463_v44  ;;  %750 = vmatpush.msrb.mxu0 %v1475_v46 }
 0x187   : > { %779 = vmatpush.msrb.mxu1 %v1480_v47  ;;  %837 = vmatpush.msrb.mxu3 %v1468_v45 }
 0x188   : > { %809 = vmatpush.msrb.mxu2 %v1487_v48  ;;  %751 = vmatpush.msrb.mxu0 %v1499_v50 }
 0x189   : > { %780 = vmatpush.msrb.mxu1 %v1504_v51  ;;  %838 = vmatpush.msrb.mxu3 %v1492_v49 }
 0x18a   : > { %810 = vmatpush.msrb.mxu2 %v1511_v52  ;;  %752 = vmatpush.msrb.mxu0 %v1523_v54 }
 0x18b   : > { %781 = vmatpush.msrb.mxu1 %v1528_v55  ;;  %839 = vmatpush.msrb.mxu3 %v1516_v53 }
 0x18c   : > { %811 = vmatpush.msrb.mxu2 %v1535_v56  ;;  %753 = vmatpush.msrb.mxu0 %v1547_v58  ;;  %v1931_v58 = vld [vmem:[#allocation9_spill] sm:$0xff] }
 0x18d   : > { %782 = vmatpush.msrb.mxu1 %v1552_v59  ;;  %840 = vmatpush.msrb.mxu3 %v1540_v57 }
 0x18e   : > { %812 = vmatpush.msrb.mxu2 %v1559_v60  ;;  %754 = vmatpush.msrb.mxu0 %v1571_v62  ;;  %v1932_v60 = vld [vmem:[#allocation10_spill] sm:$0xff] }
 0x18f   : > { %783 = vmatpush.msrb.mxu1 %v1926_v17  ;;  %841 = vmatpush.msrb.mxu3 %v1927_v18 }
 0x190   : > { %813 = vmatpush.msrb.mxu2 %v1928_v19  ;;  %755 = vmatpush.msrb.mxu0 %v1595_v2 }
 0x191   : > { %784 = vmatpush.msrb.mxu1 %v1600_v3  ;;  %842 = vmatpush.msrb.mxu3 %v1929_v20 }
 0x192   : > { %814 = vmatpush.msrb.mxu2 %v1607_v4  ;;  %756 = vmatpush.msrb.mxu0 %v1625_v61 }
 0x193   : > { %785 = vmatpush.msrb.mxu1 %v1630_v63  ;;  %843 = vmatpush.msrb.mxu3 %v1930_v21 }
 0x194   : > { %1146 = vset.pattern.permute.xlu0 %v1166_v22  ;;  %1147 = vset.pattern.permute.xlu1 %v1166_v22 }
 0x195   : > { %1148 = vset.pattern.permute.xlu2 %v1166_v22 }
 0x1ea   : > { %v586_v23 = vpop.f32.mrf.mxu0  ;;  %v615_v24 = vpop.f32.mrf.mxu1 }
 0x1eb   : > { %v616_v25 = vadd.f32 %v615_v24, %v586_v23 }
 0x1ee   : > { %v644_v26 = vpop.f32.mrf.mxu2  ;;  %v673_v27 = vpop.f32.mrf.mxu3 }
 0x1ef   : > { %v645_v28 = vadd.f32 %v644_v26, %v616_v25 }
 0x1f1   : > { %v674_v29 = vadd.f32 %v673_v27, %v645_v28 }
 0x1f2   : > { %v589_v30 = vpop.f32.mrf.mxu0  ;;  %v618_v31 = vpop.f32.mrf.mxu1 }
 0x1f3   : > { %v685_v32 = vmul.f32 0.03125, %v674_v29  ;;  %v619_v33 = vadd.f32 %v618_v31, %v589_v30 }
 0x1f5   : > { %691 = vperm.xlu0 %1146, %v685_v32  }
 0x1f6   : > { %v647_v34 = vpop.f32.mrf.mxu2  ;;  %v676_v35 = vpop.f32.mrf.mxu3 }
 0x1f7   : > { %v648_v36 = vadd.f32 %v647_v34, %v619_v33 }
 0x1f9   : > { %v677_v37 = vadd.f32 %v676_v35, %v648_v36 }
 0x1fa   : > { %v592_v38 = vpop.f32.mrf.mxu0  ;;  %v621_v39 = vpop.f32.mrf.mxu1 }
 0x1fb   : > { %v686_v40 = vmul.f32 0.03125, %v677_v37  ;;  %v622_v41 = vadd.f32 %v621_v39, %v592_v38 }
 0x1fd   : > { %696 = vperm.xlu0 %1146, %v686_v40  }
 0x1fe   : > { %v650_v42 = vpop.f32.mrf.mxu2  ;;  %v679_v43 = vpop.f32.mrf.mxu3 }
 0x1ff   : > { %v651_v44 = vadd.f32 %v650_v42, %v622_v41 }
 0x201   : > { %v680_v45 = vadd.f32 %v679_v43, %v651_v44 }
 0x202   : > { %v595_v46 = vpop.f32.mrf.mxu0  ;;  %v624_v47 = vpop.f32.mrf.mxu1 }
 0x203   : > { %v687_v48 = vmul.f32 0.03125, %v680_v45  ;;  %v625_v49 = vadd.f32 %v624_v47, %v595_v46 }
 0x205   : > { %701 = vperm.xlu1 %1147, %v687_v48  }
 0x206   : > { %v653_v50 = vpop.f32.mrf.mxu2  ;;  %v682_v51 = vpop.f32.mrf.mxu3 }
 0x207   : > { %v654_v52 = vadd.f32 %v653_v50, %v625_v49 }
 0x209   : > { %v683_v53 = vadd.f32 %v682_v51, %v654_v52 }
 0x20b   : > { %v688_v54 = vmul.f32 0.03125, %v683_v53 }
 0x20d   : > { %706 = vperm.xlu1 %1147, %v688_v54  }
 0x267   : > { %v692_v55 = vpop.permute.xlu0 %691 }
 0x268   : > { %v1745_v56 = vsub.f32 %v1634_v1, %v692_v55  ;;  %v1748_v57 = vsub.f32 %v1636_v0, %v692_v55  ;;  %v1751_v59 = vsub.f32 %v1931_v58, %v692_v55  ;;  %v1754_v61 = vsub.f32 %v1932_v60, %v692_v55 }
 0x26a   : > { %v725_v62 = vmul.f32 %v1745_v56, %v1745_v56  ;;  %v726_v63 = vmul.f32 %v1748_v57, %v1748_v57  ;;  %v727_v2 = vmul.f32 %v1751_v59, %v1751_v59  ;;  %v728_v1 = vmul.f32 %v1754_v61, %v1754_v61 }
 0x26c   : > { %757 = vmatmul.f32.vlgmr.msrb.gmra.mxu0 %v725_v62  ;;  %786 = vmatmul.f32.vlgmr.msrb.gmra.mxu1 %v726_v63 }
 0x26d   : > { %815 = vmatmul.f32.vlgmr.msrb.gmra.mxu2 %v727_v2  ;;  %844 = vmatmul.f32.vlgmr.msrb.gmra.mxu3 %v728_v1 }
 0x26f   : > { %v697_v0 = vpop.permute.xlu0 %696 }
 0x270   : > { %v1765_v3 = vsub.f32 %v1656_v7, %v697_v0  ;;  %v1768_v4 = vsub.f32 %v1658_v8, %v697_v0  ;;  %v1771_v17 = vsub.f32 %v1648_v5, %v697_v0  ;;  %v1774_v18 = vsub.f32 %v1650_v6, %v697_v0 }
 0x272   : > { %v729_v19 = vmul.f32 %v1765_v3, %v1765_v3  ;;  %v730_v20 = vmul.f32 %v1768_v4, %v1768_v4  ;;  %v731_v21 = vmul.f32 %v1771_v17, %v1771_v17  ;;  %v732_v7 = vmul.f32 %v1774_v18, %v1774_v18 }
 0x274   : > { %760 = vmatmul.f32.gmra.mxu0 %v729_v19  ;;  %789 = vmatmul.f32.gmra.mxu1 %v730_v20 }
 0x275   : > { %818 = vmatmul.f32.gmra.mxu2 %v731_v21  ;;  %847 = vmatmul.f32.gmra.mxu3 %v732_v7 }
 0x277   : > { %v702_v5 = vpop.permute.xlu1 %701 }
 0x278   : > { %v1785_v6 = vsub.f32 %v1680_v11, %v702_v5  ;;  %v1788_v8 = vsub.f32 %v1682_v12, %v702_v5  ;;  %v1791_v22 = vsub.f32 %v1672_v9, %v702_v5  ;;  %v1794_v23 = vsub.f32 %v1674_v10, %v702_v5 }
 0x27a   : > { %v733_v24 = vmul.f32 %v1785_v6, %v1785_v6  ;;  %v734_v25 = vmul.f32 %v1788_v8, %v1788_v8  ;;  %v735_v26 = vmul.f32 %v1791_v22, %v1791_v22  ;;  %v736_v11 = vmul.f32 %v1794_v23, %v1794_v23 }
 0x27c   : > { %763 = vmatmul.f32.gmra.mxu0 %v733_v24  ;;  %792 = vmatmul.f32.gmra.mxu1 %v734_v25  ;;  %v861_v24 = vld [vmem:[%s1222_s7] sm:$0xff] }
 0x27d   : > { %821 = vmatmul.f32.gmra.mxu2 %v735_v26  ;;  %850 = vmatmul.f32.gmra.mxu3 %v736_v11 }
 0x27f   : > { %v707_v9 = vpop.permute.xlu1 %706 }
 0x280   : > { %v1805_v10 = vsub.f32 %v1704_v15, %v707_v9  ;;  %v1808_v12 = vsub.f32 %v1706_v16, %v707_v9  ;;  %v1811_v27 = vsub.f32 %v1696_v13, %v707_v9  ;;  %v1814_v28 = vsub.f32 %v1698_v14, %v707_v9  ;;  %v949_v13 = vld [vmem:[%s1227_s10] sm:$0xff] }
 0x281   : > { %955 = vperm.xlu2 %1148, %v949_v13  }
 0x282   : > { %v737_v29 = vmul.f32 %v1805_v10, %v1805_v10  ;;  %v738_v30 = vmul.f32 %v1808_v12, %v1808_v12  ;;  %v739_v31 = vmul.f32 %v1811_v27, %v1811_v27  ;;  %v740_v15 = vmul.f32 %v1814_v28, %v1814_v28 }
 0x284   : > { %766 = vmatmul.f32.gmra.mxu0 %v737_v29  ;;  %795 = vmatmul.f32.gmra.mxu1 %v738_v30 }
 0x285   : > { %824 = vmatmul.f32.gmra.mxu2 %v739_v31  ;;  %853 = vmatmul.f32.gmra.mxu3 %v740_v15 }
 0x2e9   : > { %v758_v14 = vpop.f32.mrf.mxu0  ;;  %v787_v16 = vpop.f32.mrf.mxu1 }
 0x2ea   : > { %v788_v32 = vadd.f32 %v787_v16, %v758_v14 }
 0x2f0   : > { %v816_v33 = vpop.f32.mrf.mxu2  ;;  %v845_v34 = vpop.f32.mrf.mxu3 }
 0x2f1   : > { %v817_v35 = vadd.f32 %v816_v33, %v788_v32  ;;  %v761_v36 = vpop.f32.mrf.mxu0  ;;  %v790_v37 = vpop.f32.mrf.mxu1 }
 0x2f2   : > { %v791_v41 = vadd.f32 %v790_v37, %v761_v36 }
 0x2f3   : > { %v846_v38 = vadd.f32 %v845_v34, %v817_v35  ;;  %v862_v34 = vld [vmem:[%s1222_s7 + $0x8] sm:$0xff] }
 0x2f5   : > { %v857_v39 = vmul.f32 0.03125, %v846_v38 }
 0x2f7   : > { %v865_v40 = vadd.f32 1e-05, %v857_v39 }
 0x2f8   : > { %v819_v42 = vpop.f32.mrf.mxu2  ;;  %v848_v43 = vpop.f32.mrf.mxu3 }
 0x2f9   : > { %1149 = vrsqrt.f32 %v865_v40  ;;  %v820_v44 = vadd.f32 %v819_v42, %v791_v41  ;;  %v764_v45 = vpop.f32.mrf.mxu0  ;;  %v793_v46 = vpop.f32.mrf.mxu1  ;;  %vm875_vm2 = vweird.f32 %v865_v40 }
 0x2fa   : > { %v794_v51 = vadd.f32 %v793_v46, %v764_v45 }
 0x2fb   : > { %v849_v47 = vadd.f32 %v848_v43, %v820_v44  ;;  %v863_v43 = vld [vmem:[%s1222_s7 + $0x10] sm:$0xff] }
 0x2fd   : > { %v858_v48 = vmul.f32 0.03125, %v849_v47  ;;  %v952_v47 = vld [vmem:[%s1227_s10 + $0x18] sm:$0xff] }
 0x2ff   : > { %v1150_v49 = vpop.eup %1149  ;;  %v866_v50 = vadd.f32 1e-05, %v858_v48 }
 0x300   : > { %v870_v52 = vmul.f32 %v1150_v49, %v865_v40  ;;  %v822_v53 = vpop.f32.mrf.mxu2  ;;  %v851_v54 = vpop.f32.mrf.mxu3  ;;  %vm876_vm1 = vweird.f32 %v1150_v49 }
 0x301   : > { %1151 = vrsqrt.f32 %v866_v50  ;;  %v823_v55 = vadd.f32 %v822_v53, %v794_v51  ;;  %v767_v63 = vpop.f32.mrf.mxu0  ;;  %v796_v2 = vpop.f32.mrf.mxu1  ;;  %vm877_vm3 = vmor %vm875_vm2, %vm876_vm1  ;;  %vm885_vm5 = vweird.f32 %v866_v50  ;;  %v864_v51 = vld [vmem:[%s1222_s7 + $0x18] sm:$0xff]  ;;  %v950_v53 = vld [vmem:[%s1227_s10 + $0x8] sm:$0xff] }
 0x302   : > { %v871_v58 = vmul.f32 %v1150_v49, %v870_v52  ;;  %v797_v21 = vadd.f32 %v796_v2, %v767_v63 }
 0x303   : > { %v852_v60 = vadd.f32 %v851_v54, %v823_v55 }
 0x304   : > { %v872_v62 = vmul.f32 0.5, %v871_v58  ;;  %v951_v58 = vld [vmem:[%s1227_s10 + $0x10] sm:$0xff] }
 0x305   : > { %v859_v1 = vmul.f32 0.03125, %v852_v60  ;;  %v956_v60 = vpop.permute.xlu2 %955 }
 0x306   : > { %v873_v0 = vsub.f32 1.5, %v872_v62 }
 0x307   : > { %v1152_v19 = vpop.eup %1151  ;;  %v867_v20 = vadd.f32 1e-05, %v859_v1 }
 0x308   : > { %v880_v7 = vmul.f32 %v1152_v19, %v866_v50  ;;  %v825_v5 = vpop.f32.mrf.mxu2  ;;  %v874_v25 = vmul.f32 %v1150_v49, %v873_v0  ;;  %v854_v9 = vpop.f32.mrf.mxu3  ;;  %vm886_vm4 = vweird.f32 %v1152_v19 }
 0x309   : > { %1153 = vrsqrt.f32 %v867_v20  ;;  %v826_v26 = vadd.f32 %v825_v5, %v797_v21  ;;  %vm887_vm6 = vmor %vm885_vm5, %vm886_vm4  ;;  %vm895_vm8 = vweird.f32 %v867_v20 }
 0x30a   : > { %v881_v11 = vmul.f32 %v1152_v19, %v880_v7  ;;  %v878_v29 = vsel %vm877_vm3, %v1150_v49, %v874_v25 }
 0x30b   : > { %v855_v30 = vadd.f32 %v854_v9, %v826_v26  ;;  %v909_v31 = vmul.f32 %v878_v29, %v861_v24 }
 0x30c   : > { %v882_v15 = vmul.f32 0.5, %v881_v11 }
 0x30d   : > { %v860_v13 = vmul.f32 0.03125, %v855_v30  ;;  %915 = vperm.xlu2 %1148, %v909_v31  }
 0x30e   : > { %v883_v14 = vsub.f32 1.5, %v882_v15 }
 0x30f   : > { %v1154_v16 = vpop.eup %1153  ;;  %v868_v32 = vadd.f32 1e-05, %v860_v13 }
 0x310   : > { %v890_v33 = vmul.f32 %v1154_v16, %v867_v20  ;;  %v884_v35 = vmul.f32 %v1152_v19, %v883_v14  ;;  %vm896_vm7 = vweird.f32 %v1154_v16 }
 0x311   : > { %1155 = vrsqrt.f32 %v868_v32  ;;  %vm897_vm9 = vmor %vm895_vm8, %vm896_vm7  ;;  %vm905_vm11 = vweird.f32 %v868_v32 }
 0x312   : > { %v891_v36 = vmul.f32 %v1154_v16, %v890_v33  ;;  %v888_v37 = vsel %vm887_vm6, %v1152_v19, %v884_v35 }
 0x313   : > { %v910_v38 = vmul.f32 %v888_v37, %v862_v34 }
 0x314   : > { %v892_v39 = vmul.f32 0.5, %v891_v36 }
 0x315   : > { %920 = vperm.xlu2 %1148, %v910_v38  }
 0x316   : > { %v893_v40 = vsub.f32 1.5, %v892_v39 }
 0x317   : > { %v1156_v41 = vpop.eup %1155 }
 0x318   : > { %v900_v42 = vmul.f32 %v1156_v41, %v868_v32  ;;  %v894_v44 = vmul.f32 %v1154_v16, %v893_v40  ;;  %vm906_vm10 = vweird.f32 %v1156_v41 }
 0x319   : > { %vm907_vm12 = vmor %vm905_vm11, %vm906_vm10 }
 0x31a   : > { %v901_v45 = vmul.f32 %v1156_v41, %v900_v42  ;;  %v898_v46 = vsel %vm897_vm9, %v1154_v16, %v894_v44 }
 0x31b   : > { %v911_v48 = vmul.f32 %v898_v46, %v863_v43 }
 0x31c   : > { %v902_v49 = vmul.f32 0.5, %v901_v45 }
 0x31d   : > { %925 = vperm.xlu0 %1146, %v911_v48   ;;  %970 = vperm.xlu2 %1148, %v952_v47  }
 0x31e   : > { %v903_v50 = vsub.f32 1.5, %v902_v49 }
 0x320   : > { %v904_v52 = vmul.f32 %v1156_v41, %v903_v50 }
 0x322   : > { %v908_v54 = vsel %vm907_vm12, %v1156_v41, %v904_v52 }
 0x323   : > { %v912_v55 = vmul.f32 %v908_v54, %v864_v51 }
 0x325   : > { %960 = vperm.xlu0 %1146, %v950_v53   ;;  %930 = vperm.xlu1 %1147, %v912_v55  }
 0x32d   : > { %965 = vperm.xlu1 %1147, %v951_v58  }
 0x367   : > { %v916_v62 = vpop.permute.xlu2 %915 }
 0x368   : > { %v933_v63 = vmul.f32 %v916_v62, %v1745_v56  ;;  %v934_v2 = vmul.f32 %v916_v62, %v1748_v57  ;;  %v935_v1 = vmul.f32 %v916_v62, %v1751_v59  ;;  %v936_v0 = vmul.f32 %v916_v62, %v1754_v61 }
 0x36a   : > { %v1836_v19 = vadd.f32 %v956_v60, %v933_v63  ;;  %v1838_v20 = vadd.f32 %v956_v60, %v934_v2  ;;  %v1840_v21 = vadd.f32 %v956_v60, %v935_v1  ;;  %v1842_v7 = vadd.f32 %v956_v60, %v936_v0 }
 0x36c   : > { %v989_v5 = vmax.f32 %v1836_v19, 0.0  ;;  %v990_v24 = vmax.f32 %v1838_v20, 0.0  ;;  %v991_v56 = vmax.f32 %v1840_v21, 0.0  ;;  %v992_v57 = vmax.f32 %v1842_v7, 0.0 }
 0x36f   : > { %v921_v59 = vpop.permute.xlu2 %920 }
 0x370   : > { %v937_v61 = vmul.f32 %v921_v59, %v1765_v3  ;;  %v938_v26 = vmul.f32 %v921_v59, %v1768_v4  ;;  %v939_v11 = vmul.f32 %v921_v59, %v1771_v17  ;;  %v940_v9 = vmul.f32 %v921_v59, %v1774_v18 }
 0x377   : > { %v971_v34 = vpop.permute.xlu2 %970 }
 0x38f   : > { %v926_v25 = vpop.permute.xlu0 %925 }
 0x397   : > { %v961_v29 = vpop.permute.xlu0 %960  ;;  %v931_v30 = vpop.permute.xlu1 %930 }
 0x398   : > { %v977_v31 = vadd.f32 %v961_v29, %v937_v61  ;;  %v978_v15 = vadd.f32 %v961_v29, %v938_v26  ;;  %v979_v13 = vadd.f32 %v961_v29, %v939_v11  ;;  %v980_v14 = vadd.f32 %v961_v29, %v940_v9 }
 0x399   : > { %v945_v16 = vmul.f32 %v931_v30, %v1805_v10  ;;  %v946_v32 = vmul.f32 %v931_v30, %v1808_v12  ;;  %v947_v33 = vmul.f32 %v931_v30, %v1811_v27  ;;  %v948_v3 = vmul.f32 %v931_v30, %v1814_v28 }
 0x39a   : > { %v993_v4 = vmax.f32 %v977_v31, 0.0  ;;  %v994_v35 = vmax.f32 %v978_v15, 0.0  ;;  %v995_v17 = vmax.f32 %v979_v13, 0.0  ;;  %v996_v36 = vmax.f32 %v980_v14, 0.0 }
 0x39b   : > { %v985_v18 = vadd.f32 %v971_v34, %v945_v16  ;;  %v986_v37 = vadd.f32 %v971_v34, %v946_v32  ;;  %v987_v38 = vadd.f32 %v971_v34, %v947_v33  ;;  %v988_v39 = vadd.f32 %v971_v34, %v948_v3 }
 0x39c   : > { %v941_v10 = vmul.f32 %v926_v25, %v1785_v6  ;;  %v942_v12 = vmul.f32 %v926_v25, %v1788_v8  ;;  %v943_v27 = vmul.f32 %v926_v25, %v1791_v22  ;;  %v944_v28 = vmul.f32 %v926_v25, %v1794_v23 }
 0x39d   : > { %v1001_v40 = vmax.f32 %v985_v18, 0.0  ;;  %v1002_v41 = vmax.f32 %v986_v37, 0.0  ;;  %v1003_v42 = vmax.f32 %v987_v38, 0.0  ;;  %v1004_v43 = vmax.f32 %v988_v39, 0.0 }
 0x39e   : > { %1008 = sbr.rel (%p1125_p6) target bundleno = 947 (0x3b3), region = 56 }
 0x39f   : > { %v966_v44 = vpop.permute.xlu1 %965 }
 0x3a0   : > { %v981_v45 = vadd.f32 %v966_v44, %v941_v10  ;;  %v982_v46 = vadd.f32 %v966_v44, %v942_v12  ;;  %v983_v47 = vadd.f32 %v966_v44, %v943_v27  ;;  %v984_v48 = vadd.f32 %v966_v44, %v944_v28 }
 0x3a2   : > { %v997_v49 = vmax.f32 %v981_v45, 0.0  ;;  %v998_v50 = vmax.f32 %v982_v46, 0.0  ;;  %v999_v51 = vmax.f32 %v983_v47, 0.0  ;;  %v1000_v52 = vmax.f32 %v984_v48, 0.0 }
 0x3a3   : > { %1009 = vst [vmem:[#allocation2 + $0x30] sm:$0xff] %v989_v5 }
 0x3a4   : > { %1010 = vst [vmem:[#allocation2] sm:$0xff] %v990_v24 }
 0x3a5   : > { %1011 = vst [vmem:[#allocation2 + $0x58] sm:$0xff] %v991_v56 }
 0x3a6   : > { %1012 = vst [vmem:[#allocation2 + $0x18] sm:$0xff] %v992_v57 }
 0x3a7   : > { %1013 = vst [vmem:[#allocation2 + $0x50] sm:$0xff] %v993_v4 }
 0x3a8   : > { %1014 = vst [vmem:[#allocation2 + $0x68] sm:$0xff] %v994_v35 }
 0x3a9   : > { %1015 = vst [vmem:[#allocation2 + $0x8] sm:$0xff] %v995_v17 }
 0x3aa   : > { %1016 = vst [vmem:[#allocation2 + $0x48] sm:$0xff] %v996_v36 }
 0x3ab   : > { %1017 = vst [vmem:[#allocation2 + $0x40] sm:$0xff] %v997_v49 }
 0x3ac   : > { %1018 = vst [vmem:[#allocation2 + $0x20] sm:$0xff] %v998_v50 }
 0x3ad   : > { %1019 = vst [vmem:[#allocation2 + $0x10] sm:$0xff] %v999_v51 }
 0x3ae   : > { %1020 = vst [vmem:[#allocation2 + $0x38] sm:$0xff] %v1000_v52 }
 0x3af   : > { %1021 = vst [vmem:[#allocation2 + $0x60] sm:$0xff] %v1001_v40 }
 0x3b0   : > { %1022 = vst [vmem:[#allocation2 + $0x70] sm:$0xff] %v1002_v41 }
 0x3b1   : > { %1023 = vst [vmem:[#allocation2 + $0x78] sm:$0xff] %v1003_v42 }
 0x3b2   : > { %1024 = vst [vmem:[#allocation2 + $0x28] sm:$0xff] %v1004_v43 }
 0x3b3 PF: > { %p1126_p7 = scmp.ne.s32.totalorder %s1208_s22, 1 }
 0x3b5   : > { %1028 = sbr.rel (%p1126_p7) target bundleno = 964 (0x3c4), region = 60 }
 0x3ba   : > { %v1029_v6 = vpack.c.bf16 %v990_v24, %v989_v5  ;;  %v1030_v8 = vpack.c.bf16 %v992_v57, %v991_v56  ;;  %v1031_v22 = vpack.c.bf16 %v994_v35, %v993_v4  ;;  %v1032_v23 = vpack.c.bf16 %v996_v36, %v995_v17 }
 0x3bb   : > { %v1033_v53 = vpack.c.bf16 %v998_v50, %v997_v49  ;;  %v1034_v54 = vpack.c.bf16 %v1000_v52, %v999_v51  ;;  %v1035_v55 = vpack.c.bf16 %v1002_v41, %v1001_v40  ;;  %v1036_v58 = vpack.c.bf16 %v1004_v43, %v1003_v42 }
 0x3bc   : > { %1037 = vst [vmem:[%s1911_s6] sm:$0xff] %v1029_v6 }
 0x3bd   : > { %1038 = vst [vmem:[%s1911_s6 + $0x8] sm:$0xff] %v1030_v8 }
 0x3be   : > { %1039 = vst [vmem:[%s1911_s6 + $0x10] sm:$0xff] %v1031_v22 }
 0x3bf   : > { %1040 = vst [vmem:[%s1911_s6 + $0x18] sm:$0xff] %v1032_v23 }
 0x3c0   : > { %1041 = vst [vmem:[%s1911_s6 + $0x20] sm:$0xff] %v1033_v53 }
 0x3c1   : > { %1042 = vst [vmem:[%s1911_s6 + $0x28] sm:$0xff] %v1034_v54 }
 0x3c2   : > { %1043 = vst [vmem:[%s1911_s6 + $0x30] sm:$0xff] %v1035_v55 }
 0x3c3   : > { %1044 = vst [vmem:[%s1911_s6 + $0x38] sm:$0xff] %v1036_v58 }
 0x3c4 PF: > { %s16_s21 = sadd.s32 1, %s1163_s21  }
 0x3c5   : > { %p13_p8 = scmp.ge.s32.totalorder %s16_s21, 4  }
 0x3c7   :  { %15 = sbr.rel (!%p13_p8) target bundleno = 1 (0x1), region = 92 }

</bundles_post_ra>
